<compile_context>
chip_gen: v6e
topology: v6e:2x2x1
jax: 0.10.0
libtpu: 0.0.40
codegen_flags: <defaults>
</compile_context>

<pallas_src>
import jax
import jax.numpy as jnp
from jax.experimental import pallas as pl
from jax.experimental.pallas import tpu as pltpu

NEG_BIG = -1e30  # fills padded logit lanes; exp() underflows to exactly 0.


def mlp_kernel(emb_ref, tok_ref, off_ref, end_ref,
               w1_ref, b1_ref, w2_ref, b2_ref, out_ref):
    V, E = emb_ref.shape
    T = tok_ref.shape[0]
    B = off_ref.shape[0]

    # --- EmbeddingBag(mean) fused in-kernel ---------------------------------
    # one-hot token matrix [T, V]: onehot[t, v] = (inputs[t] == v)
    v_iota = jax.lax.broadcasted_iota(jnp.int32, (T, V), 1)
    onehot = (v_iota == tok_ref[...]).astype(jnp.float32)

    # bag-membership mask [B, T]: mask[b, t] = offsets[b] <= t < ends[b]
    t_iota = jax.lax.broadcasted_iota(jnp.int32, (B, T), 1)
    mask = ((t_iota >= off_ref[...]) & (t_iota < end_ref[...])).astype(jnp.float32)
    counts = jnp.maximum((end_ref[...] - off_ref[...]).astype(jnp.float32), 1.0)  # [B,1]

    # ([B,T] @ [T,V]) @ [V,E]  ==  sum of token embeddings per bag, then mean.
    bag_counts = jnp.dot(mask, onehot, preferred_element_type=jnp.float32)        # [B,V]
    bag = jnp.dot(bag_counts, emb_ref[...], preferred_element_type=jnp.float32)   # [B,E]
    bag = bag / counts

    # --- linear1 + relu ------------------------------------------------------
    h = jnp.dot(bag, w1_ref[...], preferred_element_type=jnp.float32) + b1_ref[...]
    h = jnp.maximum(h, 0.0)

    # --- linear2 (lane-dense, C padded to 128) -------------------------------
    logits = jnp.dot(h, w2_ref[...], preferred_element_type=jnp.float32) + b2_ref[...]

    # --- log_softmax over classes (padded lanes hold NEG_BIG -> exp == 0) ----
    m = jnp.max(logits, axis=-1, keepdims=True)
    z = logits - m
    lse = jnp.log(jnp.sum(jnp.exp(z), axis=-1, keepdims=True))
    out_ref[...] = z - lse


def mlp_forward(emb_table, w1, b1, w2, b2, inputs, offsets):
    """inputs: [T] int32 token ids; offsets: [B] int32 bag start offsets."""
    T = inputs.shape[0]
    B = offsets.shape[0]
    V, E = emb_table.shape
    H = w1.shape[1]
    C = w2.shape[1]

    LANE = 128
    C_pad = ((C + LANE - 1) // LANE) * LANE

    # Tiny wrapper-side prep (no gathers, no [T,E]/[B,T] float intermediates):
    ends = jnp.concatenate([offsets[1:], jnp.array([T], jnp.int32)])
    tok_col = inputs.astype(jnp.int32).reshape(T, 1)
    off_col = offsets.astype(jnp.int32).reshape(B, 1)
    end_col = ends.astype(jnp.int32).reshape(B, 1)

    b1_2d = b1.reshape(1, H)
    # Pad the class dim to a full 128-lane slab; padded bias lanes get NEG_BIG
    # so they contribute nothing to the log_softmax.
    w2p = jnp.zeros((H, C_pad), jnp.float32).at[:, :C].set(w2)
    b2p = jnp.full((1, C_pad), NEG_BIG, jnp.float32).at[0, :C].set(b2)

    vmem = lambda: pl.BlockSpec(memory_space=pltpu.MemorySpace.VMEM)
    out_padded = pl.pallas_call(
        mlp_kernel,
        out_shape=jax.ShapeDtypeStruct((B, C_pad), jnp.float32),
        in_specs=[vmem() for _ in range(8)],
        out_specs=vmem(),
    )(emb_table, tok_col, off_col, end_col, w1, b1_2d, w2p, b2p)
    return out_padded[:, :C]


if __name__ == "__main__":
    key = jax.random.PRNGKey(0)
    k_emb, k_w1, k_b1, k_w2, k_b2, k_tok, k_off = jax.random.split(key, 7)

    vocab_size = 50     # len(vocab)
    embedding_dim = 32  # pt_embeddings.shape[1]
    hidden_dim = 32
    num_class = 4
    B = 8               # number of bags (batch)
    T = 24              # total tokens across all bags

    # Synthetic "pretrained" embedding table, uniform(-0.1, 0.1) like the module.
    emb_table = jax.random.uniform(
        k_emb, (vocab_size, embedding_dim), jnp.float32, -0.1, 0.1)

    # Linear layers (PyTorch default uniform(-1/sqrt(fan_in), 1/sqrt(fan_in))),
    # stored as [in, out] so the kernel computes x @ W + b.
    bound1 = 1.0 / (embedding_dim ** 0.5)
    w1 = jax.random.uniform(k_w1, (embedding_dim, hidden_dim), jnp.float32, -bound1, bound1)
    b1 = jax.random.uniform(k_b1, (hidden_dim,), jnp.float32, -bound1, bound1)
    bound2 = 1.0 / (hidden_dim ** 0.5)
    w2 = jax.random.uniform(k_w2, (hidden_dim, num_class), jnp.float32, -bound2, bound2)
    b2 = jax.random.uniform(k_b2, (num_class,), jnp.float32, -bound2, bound2)

    # Example ragged batch: 8 bags of 3 tokens each (offsets 0,3,6,...).
    inputs = jax.random.randint(k_tok, (T,), 0, vocab_size, jnp.int32)
    offsets = jnp.arange(0, T, T // B, dtype=jnp.int32)

    log_probs = mlp_forward(emb_table, w1, b1, w2, b2, inputs, offsets)
    jax.block_until_ready(log_probs)

    # Pure-JAX reference (EmbeddingBag mean via gather) for correctness.
    def ref(emb_table, w1, b1, w2, b2, inputs, offsets):
        tok = emb_table[inputs]
        ends = jnp.concatenate([offsets[1:], jnp.array([T], jnp.int32)])
        t_idx = jnp.arange(T)
        mask = (t_idx[None, :] >= offsets[:, None]) & (t_idx[None, :] < ends[:, None])
        counts = jnp.maximum(ends - offsets, 1).astype(jnp.float32)
        bag = (mask.astype(jnp.float32) @ tok) / counts[:, None]
        h = jnp.maximum(bag @ w1 + b1, 0.0)
        logits = h @ w2 + b2
        return jax.nn.log_softmax(logits, axis=1)

    expected = ref(emb_table, w1, b1, w2, b2, inputs, offsets)
    assert log_probs.shape == (B, num_class)
    assert jnp.allclose(log_probs, expected, atol=1e-5, rtol=1e-5)
    print("KERNEL_OK")
</pallas_src>

<mosaic_0001>
module attributes {stable_mosaic.version = 11 : i64} {
  func.func @mlp_kernel(%arg0: memref<50x32xf32, #tpu.memory_space<vmem>>, %arg1: memref<24x1xi32, #tpu.memory_space<vmem>>, %arg2: memref<8x1xi32, #tpu.memory_space<vmem>>, %arg3: memref<8x1xi32, #tpu.memory_space<vmem>>, %arg4: memref<32x32xf32, #tpu.memory_space<vmem>>, %arg5: memref<1x32xf32, #tpu.memory_space<vmem>>, %arg6: memref<32x128xf32, #tpu.memory_space<vmem>>, %arg7: memref<1x128xf32, #tpu.memory_space<vmem>>, %arg8: memref<8x128xf32, #tpu.memory_space<vmem>>) attributes {dimension_semantics = [], scalar_prefetch = 0 : i64, scratch_operands = 0 : i64, tpu.core_type = #tpu.core_type<tc>} {
    %0 = tpu.iota {dimensions = array<i32: 1>} : vector<24x50xi32>
    %c0 = arith.constant 0 : index
    %c0_0 = arith.constant 0 : index
    %1 = vector.load %arg1[%c0, %c0_0] : memref<24x1xi32, #tpu.memory_space<vmem>>, vector<24x1xi32>
    %2 = vector.broadcast %1 : vector<24x1xi32> to vector<24x50xi32>
    %3 = arith.cmpi eq, %0, %2 : vector<24x50xi32>
    %4 = arith.extui %3 : vector<24x50xi1> to vector<24x50xi32>
    %5 = arith.sitofp %4 : vector<24x50xi32> to vector<24x50xf32>
    %6 = tpu.iota {dimensions = array<i32: 1>} : vector<8x24xi32>
    %c0_1 = arith.constant 0 : index
    %c0_2 = arith.constant 0 : index
    %7 = vector.load %arg2[%c0_1, %c0_2] : memref<8x1xi32, #tpu.memory_space<vmem>>, vector<8x1xi32>
    %8 = vector.broadcast %7 : vector<8x1xi32> to vector<8x24xi32>
    %9 = arith.cmpi sge, %6, %8 : vector<8x24xi32>
    %c0_3 = arith.constant 0 : index
    %c0_4 = arith.constant 0 : index
    %10 = vector.load %arg3[%c0_3, %c0_4] : memref<8x1xi32, #tpu.memory_space<vmem>>, vector<8x1xi32>
    %11 = vector.broadcast %10 : vector<8x1xi32> to vector<8x24xi32>
    %12 = arith.cmpi slt, %6, %11 : vector<8x24xi32>
    %13 = arith.andi %9, %12 : vector<8x24xi1>
    %14 = arith.extui %13 : vector<8x24xi1> to vector<8x24xi32>
    %15 = arith.sitofp %14 : vector<8x24xi32> to vector<8x24xf32>
    %c0_5 = arith.constant 0 : index
    %c0_6 = arith.constant 0 : index
    %16 = vector.load %arg3[%c0_5, %c0_6] : memref<8x1xi32, #tpu.memory_space<vmem>>, vector<8x1xi32>
    %c0_7 = arith.constant 0 : index
    %c0_8 = arith.constant 0 : index
    %17 = vector.load %arg2[%c0_7, %c0_8] : memref<8x1xi32, #tpu.memory_space<vmem>>, vector<8x1xi32>
    %18 = arith.subi %16, %17 : vector<8x1xi32>
    %19 = arith.sitofp %18 : vector<8x1xi32> to vector<8x1xf32>
    %cst = arith.constant 1.000000e+00 : f32
    %20 = vector.broadcast %cst : f32 to vector<8x1xf32>
    %21 = arith.maximumf %19, %20 : vector<8x1xf32>
    %cst_9 = arith.constant dense<0.000000e+00> : vector<8x50xf32>
    %22 = tpu.matmul %15, %5, %cst_9 {dimension_numbers = #tpu.dot_dimension_numbers<[1], [0], [0], [1], [0, 0, 1, 1], [], []>} : vector<8x24xf32>, vector<24x50xf32>, vector<8x50xf32> -> vector<8x50xf32>
    %c0_10 = arith.constant 0 : index
    %c0_11 = arith.constant 0 : index
    %23 = vector.load %arg0[%c0_10, %c0_11] : memref<50x32xf32, #tpu.memory_space<vmem>>, vector<50x32xf32>
    %cst_12 = arith.constant dense<0.000000e+00> : vector<8x32xf32>
    %24 = tpu.matmul %22, %23, %cst_12 {dimension_numbers = #tpu.dot_dimension_numbers<[1], [0], [0], [1], [0, 0, 1, 1], [], []>} : vector<8x50xf32>, vector<50x32xf32>, vector<8x32xf32> -> vector<8x32xf32>
    %25 = vector.broadcast %21 : vector<8x1xf32> to vector<8x32xf32>
    %26 = arith.divf %24, %25 : vector<8x32xf32>
    %c0_13 = arith.constant 0 : index
    %c0_14 = arith.constant 0 : index
    %27 = vector.load %arg4[%c0_13, %c0_14] : memref<32x32xf32, #tpu.memory_space<vmem>>, vector<32x32xf32>
    %cst_15 = arith.constant dense<0.000000e+00> : vector<8x32xf32>
    %28 = tpu.matmul %26, %27, %cst_15 {dimension_numbers = #tpu.dot_dimension_numbers<[1], [0], [0], [1], [0, 0, 1, 1], [], []>} : vector<8x32xf32>, vector<32x32xf32>, vector<8x32xf32> -> vector<8x32xf32>
    %c0_16 = arith.constant 0 : index
    %c0_17 = arith.constant 0 : index
    %29 = vector.load %arg5[%c0_16, %c0_17] : memref<1x32xf32, #tpu.memory_space<vmem>>, vector<1x32xf32>
    %30 = vector.broadcast %29 : vector<1x32xf32> to vector<8x32xf32>
    %31 = arith.addf %28, %30 : vector<8x32xf32>
    %cst_18 = arith.constant 0.000000e+00 : f32
    %32 = vector.broadcast %cst_18 : f32 to vector<8x32xf32>
    %33 = arith.maximumf %31, %32 : vector<8x32xf32>
    %c0_19 = arith.constant 0 : index
    %c0_20 = arith.constant 0 : index
    %34 = vector.load %arg6[%c0_19, %c0_20] : memref<32x128xf32, #tpu.memory_space<vmem>>, vector<32x128xf32>
    %cst_21 = arith.constant dense<0.000000e+00> : vector<8x128xf32>
    %35 = tpu.matmul %33, %34, %cst_21 {dimension_numbers = #tpu.dot_dimension_numbers<[1], [0], [0], [1], [0, 0, 1, 1], [], []>} : vector<8x32xf32>, vector<32x128xf32>, vector<8x128xf32> -> vector<8x128xf32>
    %c0_22 = arith.constant 0 : index
    %c0_23 = arith.constant 0 : index
    %36 = vector.load %arg7[%c0_22, %c0_23] : memref<1x128xf32, #tpu.memory_space<vmem>>, vector<1x128xf32>
    %37 = vector.broadcast %36 : vector<1x128xf32> to vector<8x128xf32>
    %38 = arith.addf %35, %37 : vector<8x128xf32>
    %cst_24 = arith.constant dense<0xFF800000> : vector<8xf32>
    %39 = vector.multi_reduction <maximumf>, %38, %cst_24 [1] : vector<8x128xf32> to vector<8xf32>
    %40 = vector.shape_cast %39 : vector<8xf32> to vector<8x1xf32>
    %41 = vector.broadcast %40 : vector<8x1xf32> to vector<8x128xf32>
    %42 = arith.subf %38, %41 : vector<8x128xf32>
    %43 = math.exp %42 : vector<8x128xf32>
    %cst_25 = arith.constant dense<0.000000e+00> : vector<8xf32>
    %44 = vector.multi_reduction <add>, %43, %cst_25 [1] : vector<8x128xf32> to vector<8xf32>
    %45 = vector.shape_cast %44 : vector<8xf32> to vector<8x1xf32>
    %46 = math.log %45 : vector<8x1xf32>
    %47 = vector.broadcast %46 : vector<8x1xf32> to vector<8x128xf32>
    %48 = arith.subf %42, %47 : vector<8x128xf32>
    %c0_26 = arith.constant 0 : index
    %c0_27 = arith.constant 0 : index
    %49 = vector.load %arg8[%c0_26, %c0_27] : memref<8x128xf32, #tpu.memory_space<vmem>>, vector<8x128xf32>
    tpu.vector_store %arg8[%c0_26, %c0_27], %48 {strides = array<i32>} : memref<8x128xf32, #tpu.memory_space<vmem>>, vector<8x128xf32>,
    return
  }
}

</mosaic_0001>

<bundles_post_ra>
// kernel: tpu_custom_call.1
= control target key start
LH: loop header
LB: loop body
LE: loop exit
PB: predicated region body
PF: predicated region fallthrough
CT: control target
= control target key end

     0   :  { %v549_v3 = vmov 0   ;;  %s697_s0 = inlined_call_operand.vmem [shape: f32[50,32], index: 0, kind: input, shape index: {}]   ;;  %s698_s1 = inlined_call_operand.vmem [shape: s32[24,1], index: 1, kind: input, shape index: {}]   ;;  %s699_s2 = inlined_call_operand.vmem [shape: s32[8,1], index: 2, kind: input, shape index: {}]   ;;  %s700_s3 = inlined_call_operand.vmem [shape: s32[8,1], index: 3, kind: input, shape index: {}]   ;;  %s701_s4 = inlined_call_operand.vmem [shape: f32[32,32], index: 4, kind: input, shape index: {}]   ;;  %s702_s5 = inlined_call_operand.vmem [shape: f32[1,32], index: 5, kind: input, shape index: {}]   ;;  %s703_s6 = inlined_call_operand.vmem [shape: f32[32,128], index: 6, kind: input, shape index: {}]   ;;  %s704_s7 = inlined_call_operand.vmem [shape: f32[1,128], index: 7, kind: input, shape index: {}]   ;;  %s705_s8 = inlined_call_operand.hbm [shape: f32[8,128], index: 8, kind: output, shape index: {}]  }
   0x1   :  { %v53_v0 = vld [vmem:[%s699_s2] sm:$0xff]  ;;  %v34_v2 = vld [vmem:[%s698_s1 + $0x10] sm:$0xff]  ;;  %520 = vset.pattern.permute.xlu1 %v549_v3  ;;  %519 = vset.pattern.permute.xlu0 %v549_v3 }
   0x2   :  { %v58_v1 = vld [vmem:[%s700_s3] sm:$0xff] }
   0x3   :  { %v66_v4 = vsub.s32 %v58_v1, %v53_v0 }
   0x4   :  { %13 = vsyncpa [#allocation3], 0  ;;  %55 = vperm.xlu1 %520, %v53_v0   ;;  %42 = vperm.xlu0 %519, %v34_v2   ;;  %v33_v6 = vld [vmem:[%s698_s1 + $0x8] sm:$0xff]  ;;  %v550_v7 = vmov 0.0   ;;  %v32_v9 = vld [vmem:[%s698_s1] sm:$0xff]  ;;  %vm551_vm0 = vmmov 0   ;;  %v30_v10 = vlaneseq }
   0x5   :  { %v67_v5 = vcvt.s32.f32 %v66_v4  ;;  %466 = vmatprep.subr.mxu1 %v550_v7  ;;  %492 = vmatprep.subr.mxu0 %v550_v7  ;;  %v552_v14 = vmov 1.0   ;;  %vm69_vm6 = vcmask 195584   ;;  %v149_v18 = vld [vmem:[%s697_s0 + $0x30] sm:$0x3]  ;;  %vm154_vm8 = vcmask 1041408   ;;  %v148_v20 = vld [vmem:[%s697_s0 + $0x28] sm:$0xff] }
   0x6   :  { %472 = vmatprep.mubr.msk.f32.mxu1 %vm551_vm0, %v550_v7  ;;  %500 = vmatprep.mubr.msk.f32.mxu0 %vm551_vm0, %v550_v7  ;;  %v31_v11 = vand.u32 127, %v30_v10  ;;  %v147_v21 = vld [vmem:[%s697_s0 + $0x20] sm:$0xff]  ;;  %v146_v22 = vld [vmem:[%s697_s0 + $0x18] sm:$0xff]  ;;  %v145_v23 = vld [vmem:[%s697_s0 + $0x10] sm:$0xff]  ;;  %vm150_vm9 = vcmask 408576   ;;  %vm246_vm10 = vcmask 261120  }
   0x7   :  { %v68_v8 = vmax.f32 %v67_v5, 1.0  ;;  %v144_v24 = vld [vmem:[%s697_s0 + $0x8] sm:$0xff]  ;;  %v143_v25 = vld [vmem:[%s697_s0] sm:$0xff]  ;;  %v238_v26 = vld [vmem:[%s701_s4 + $0x18] sm:$0xff] }
   0x8   :  { %60 = vperm.xlu1 %520, %v58_v1   ;;  %39 = vperm.xlu0 %519, %v33_v6   ;;  %v237_v27 = vld [vmem:[%s701_s4 + $0x10] sm:$0xff]  ;;  %v236_v30 = vld [vmem:[%s701_s4 + $0x8] sm:$0xff]  ;;  %v235_v31 = vld [vmem:[%s701_s4] sm:$0xff] }
   0x9   :  { %493 = vmatpush3.msra.mxu0 %v238_v26  ;;  %v324_v36 = vld [vmem:[%s703_s6 + $0x18] sm:$0xff]  ;;  %v323_v38 = vld [vmem:[%s703_s6 + $0x10] sm:$0xff]  ;;  %v322_v39 = vld [vmem:[%s703_s6 + $0x8] sm:$0xff] }
   0xa   :  { %494 = vmatprep.subr.mxu0 %v550_v7  ;;  %v321_v40 = vld [vmem:[%s703_s6] sm:$0xff] }
   0xb   :  { %495 = vmatpush3.msra.mxu0 %v237_v27  ;;  %v440_v41 = vld [vmem:[%s702_s5] ss:$0 sm:$0xff]  ;;  %s553_s5 = smov [#allocation2]  }
   0xc   :  { %230 = vperm.xlu1 %520, %v68_v8   ;;  %36 = vperm.xlu0 %519, %v32_v9   ;;  %v442_v46 = vld [vmem:[%s704_s7] ss:$0 sm:$0xff]  ;;  %s422_s6 = sshll.u32 %s553_s5, 4  ;;  %s423_s6 = int_to_ptr.vmem [resolvable:$true] %s422_s6 }
   0xd   :  { %496 = vmatprep.subr.mxu0 %v550_v7  ;;  %s527_s7 = scalar_lea.vmem %s423_s6, 128  ;;  %p532_p1 = scmp.lt.s32.totalorder %s423_s6, %s423_s6 }
   0xe   :  { %497 = vmatpush3.msra.mxu0 %v236_v30  ;;  %p528_p0 = scmp.ne.s32.totalorder %s423_s6, %s527_s7  ;;  %p533_p2 = scmp.lt.s32.totalorder %s527_s7, %s527_s7 }
   0xf   :  { %498 = vmatprep.subr.mxu0 %v550_v7 }
  0x10   :  { %499 = vmatpush3.msra.mxu0 %v235_v31  ;;  %p534_p3 = por %p533_p2, %p532_p1 }
  0x11   :  { %503 = vmatprep.subr.mxu0 %v550_v7 }
  0x12   :  { %p535_p4 = pnand %p534_p3, %p528_p0 }
  0x7f   :  { %v56_v12 = vpop.permute.xlu1 %55  ;;  %v43_v13 = vpop.permute.xlu0 %42 }
  0x80   :  { %vm46_vm1 = vcmp.eq.s32.totalorder %v31_v11, %v43_v13  ;;  %vm57_vm2 = vcmp.ge.s32.totalorder %v31_v11, %v56_v12 }
  0x81   :  { %467 = vmatpush3.msk.msra.mxu1 %vm46_vm1, %v552_v14 }
  0x82   :  { %468 = vmatprep.subr.mxu1 %v550_v7 }
  0x83   :  { %v61_v15 = vpop.permute.xlu1 %60  ;;  %v40_v16 = vpop.permute.xlu0 %39 }
  0x84   :  { %vm62_vm3 = vcmp.lt.s32.totalorder %v31_v11, %v61_v15  ;;  %vm45_vm4 = vcmp.eq.s32.totalorder %v31_v11, %v40_v16 }
  0x85   :  { %469 = vmatpush3.msk.msra.mxu1 %vm45_vm4, %v552_v14  ;;  %vm63_vm5 = vmand %vm57_vm2, %vm62_vm3 }
  0x86   :  { %470 = vmatprep.subr.mxu1 %v550_v7  ;;  %v433_v19 = vsel %vm63_vm5, 1.0, %v550_v7 }
  0x87   :  { %v37_v17 = vpop.permute.xlu0 %36  ;;  %v231_v32 = vpop.permute.xlu1 %230 }
  0x88   :  { %vm44_vm7 = vcmp.eq.s32.totalorder %v31_v11, %v37_v17  ;;  %521 = vrcp.f32 %v231_v32 }
  0x89   :  { %471 = vmatpush3.msk.msra.mxu1 %vm44_vm7, %v552_v14 }
  0x8a   :  { %473 = vmatmul.mubr.msk.f32.vlgmr.msra.gmra.mxu1 %vm69_vm6, %v433_v19  ;;  %475 = vmatprep.subr.mxu1 %v550_v7 }
  0x8b   :  { %476 = vmatpush3.msk.msra.mxu1 %vm154_vm8, %v149_v18  ;;  %489 = vmatprep.mubr.msk.f32.mxu1 %vm551_vm0, %v550_v7 }
  0x8c   :  { %477 = vmatprep.subr.mxu1 %v550_v7 }
  0x8d   :  { %478 = vmatpush3.msra.mxu1 %v148_v20 }
  0x8e   :  { %479 = vmatprep.subr.mxu1 %v550_v7 }
  0x8f   :  { %480 = vmatpush3.msra.mxu1 %v147_v21 }
  0x90   :  { %481 = vmatprep.subr.mxu1 %v550_v7 }
  0x91   :  { %482 = vmatpush3.msra.mxu1 %v146_v22 }
  0x92   :  { %483 = vmatprep.subr.mxu1 %v550_v7 }
  0x93   :  { %484 = vmatpush3.msra.mxu1 %v145_v23 }
  0x94   :  { %485 = vmatprep.subr.mxu1 %v550_v7 }
  0x95   :  { %486 = vmatpush3.msra.mxu1 %v144_v24  ;;  %v522_v33 = vpop.eup %521 }
  0x96   :  { %487 = vmatprep.subr.mxu1 %v550_v7 }
  0x97   :  { %488 = vmatpush3.msra.mxu1 %v143_v25 }
 0x14a   :  { %v139_v28 = vpop.f32.mrf.mxu1 }
 0x14b   :  { %490 = vmatmul.mubr.msk.f32.vlgmr.msra.gmra.mxu1 %vm150_vm9, %v139_v28 }
 0x14c   :  { %v474_v29 = vpop.f32.mrf.mxu1 }
 0x20b   :  { %v224_v34 = vpop.f32.mrf.mxu1 }
 0x20c   :  { %v234_v35 = vmul.f32 %v522_v33, %v224_v34 }
 0x20d   :  { %v491_v37 = vpop.f32.mrf.mxu1 }
 0x20e   :  { %501 = vmatmul.mubr.msk.f32.vlgmr.msra.gmra.mxu0 %vm246_vm10, %v234_v35 }
 0x20f   :  { %504 = vmatpush3.msra.mxu0 %v324_v36  ;;  %511 = vmatprep.mubr.msk.f32.mxu0 %vm551_vm0, %v550_v7 }
 0x210   :  { %505 = vmatprep.subr.mxu0 %v550_v7 }
 0x211   :  { %506 = vmatpush3.msra.mxu0 %v323_v38 }
 0x212   :  { %507 = vmatprep.subr.mxu0 %v550_v7 }
 0x213   :  { %508 = vmatpush3.msra.mxu0 %v322_v39 }
 0x214   :  { %509 = vmatprep.subr.mxu0 %v550_v7 }
 0x215   :  { %510 = vmatpush3.msra.mxu0 %v321_v40 }
 0x2ce   :  { %v316_v42 = vpop.f32.mrf.mxu0 }
 0x2cf   :  { %v317_v43 = vadd.f32 %v440_v41, %v316_v42 }
 0x2d0   :  { %v502_v44 = vpop.f32.mrf.mxu0 }
 0x2d1   :  { %v320_v45 = vmax.f32 %v317_v43, 0.0 }
 0x2d3   :  { %512 = vmatmul.mubr.msk.f32.vlgmr.msra.gmra.mxu0 %vm246_vm10, %v320_v45 }
 0x393   :  { %v401_v47 = vpop.f32.mrf.mxu0 }
 0x394   :  { %v402_v48 = vadd.f32 %v442_v46, %v401_v47 }
 0x395   :  { %v513_v49 = vpop.f32.mrf.mxu0 }
 0x396   :  { %405 = vmax.xlane.f32.xlu0 %v402_v48 }
 0x41f   :  { %v406_v50 = vpop.xlane.xlu0 %405 }
 0x420   :  { %v407_v51 = vsub.f32 %v402_v48, %v406_v50 }
 0x422   :  { %v408_v52 = vmul.f32 1.442695, %v407_v51 }
 0x424   :  { %523 = vpow2.f32 %v408_v52 }
 0x431   :  { %v524_v53 = vpop.eup %523 }
 0x432   :  { %410 = vadd.xlane.f32.xlu1 %v524_v53 }
 0x4bb   :  { %v411_v54 = vpop.xlane.xlu1 %410 }
 0x4bc   :  { %525 = vlog2.f32 %v411_v54 }
 0x4c9   :  { %v526_v55 = vpop.eup %525 }
 0x4ca   :  { %v413_v56 = vmul.f32 0.6931472, %v526_v55 }
 0x4cc   :  { %v414_v57 = vsub.f32 %v407_v51, %v413_v56 }
 0x4ce   :  { %415 = vst [vmem:[#allocation2] sm:$0xff] %v414_v57 }
 0x4cf   :  { %538 = shalt.err (!%p535_p4)
}
 0x4d0   :  { %425 = dma.vmem_to_hbm [thread:$0]  %s423_s6, 128, %s705_s8, [#allocation3]  }
 0x4d1   :  { %547 = dma.done.wait [#allocation3], 128  }
 0x4d2   :  { %548 = vsyncadd [#allocation3], 4294967168 }
 0x4d3   :  { %429 = vsyncpa [#allocation3], 1 }

</bundles_post_ra>
